<compile_context>
chip_gen: v5e
topology: v5e:2x2
jax: 0.10.0
libtpu: 0.0.40
codegen_flags: <defaults>
</compile_context>

<pallas_src>
import functools

import jax
import jax.numpy as jnp
from jax.experimental import pallas as pl
from jax.experimental.pallas import tpu as pltpu

_LANE = 128


@functools.lru_cache(maxsize=1)
def _budgets():
    """Per-generation (block byte budget, scoped VMEM limit)."""
    kind = ""
    try:
        kind = jax.devices()[0].device_kind.lower()
    except Exception:  # pragma: no cover - defensive
        pass
    if ("v5" in kind) or ("v6" in kind):
        # v5e/v5p/v6e: 128 MiB physical VMEM -> larger blocks amortize the
        # ~0.35 us per-grid-step overhead.
        return 12 << 20, 96 << 20
    # Conservative default: safe on v7x (64 MiB VMEM per TensorCore).
    # Peak for the streaming pass ~ 4x block (double-buffered in+out) + temps.
    return 8 << 20, 48 << 20


# --------------------------------------------------------------------------
# Fused path: whole (padded-free) spatial extent resident in one block.
# --------------------------------------------------------------------------
def _fused_kernel(x_ref, w1t_ref, w2t_ref, o_ref, *, inv_hw):
    # x_ref / o_ref: (bn, C, HW); w1t_ref: (C, Cr); w2t_ref: (Cr, C)
    xf = x_ref[...].astype(jnp.float32)
    means = jnp.sum(xf, axis=-1) * inv_hw                          # (bn, C)
    y = jnp.dot(means, w1t_ref[...].astype(jnp.float32),
                preferred_element_type=jnp.float32)                # (bn, Cr)
    y = jnp.maximum(y, 0.0)
    y = jnp.dot(y, w2t_ref[...].astype(jnp.float32),
                preferred_element_type=jnp.float32)                # (bn, C)
    y = jax.nn.sigmoid(y)
    # Multiply in f32, cast once at the store.
    o_ref[...] = (xf * y[:, :, None]).astype(o_ref.dtype)


# --------------------------------------------------------------------------
# Tiled fallback (large images): pass 1 = pool + SE-MLP, pass 2 = rescale.
# --------------------------------------------------------------------------
def _pool_mlp_kernel(x_ref, w1t_ref, w2t_ref, scale_ref, acc_ref,
                     *, inv_hw, hw, thw, need_mask):
    # x_ref: (1, C, thw); scale_ref: (1, C, 1) f32; acc_ref: (1, C) f32
    h = pl.program_id(1)

    @pl.when(h == 0)
    def _():
        acc_ref[...] = jnp.zeros_like(acc_ref)

    xf = x_ref[...].astype(jnp.float32)
    if need_mask:
        # Ragged spatial tail: lanes past HW in the last (partial) tile hold
        # garbage; neutralize them before the reduction.
        lane = jax.lax.broadcasted_iota(jnp.int32, xf.shape, 2)
        xf = jnp.where((h * thw + lane) < hw, xf, 0.0)
    acc_ref[...] += jnp.sum(xf, axis=-1)

    @pl.when(h == pl.num_programs(1) - 1)
    def _():
        means = acc_ref[...] * inv_hw                               # (1, C)
        y = jnp.dot(means, w1t_ref[...].astype(jnp.float32),
                    preferred_element_type=jnp.float32)             # (1, Cr)
        y = jnp.maximum(y, 0.0)
        y = jnp.dot(y, w2t_ref[...].astype(jnp.float32),
                    preferred_element_type=jnp.float32)             # (1, C)
        scale_ref[...] = jax.nn.sigmoid(y)[:, :, None]


def _scale_kernel(x_ref, scale_ref, o_ref):
    # x_ref / o_ref: (1, C, thw); scale_ref: (1, C, 1) f32
    o_ref[...] = (x_ref[...].astype(jnp.float32) * scale_ref[...]).astype(
        o_ref.dtype)


# --------------------------------------------------------------------------
# Wrapper
# --------------------------------------------------------------------------
def ca_layer(x, w1, w2, *, block_budget_bytes=None, vmem_limit_bytes=None):
    """CALayer forward. x: (N, C, H, W); w1: (C//r, C); w2: (C, C//r)."""
    N, C, H, W = x.shape
    Cr = w1.shape[0]
    HW = H * W
    itemsize = jnp.dtype(x.dtype).itemsize

    def_budget, def_limit = _budgets()
    block_budget = block_budget_bytes or def_budget
    vmem_limit = vmem_limit_bytes or def_limit

    x_flat = x.reshape(N, C, HW)       # contiguous dims -> free reshape
    w1t = w1.T                         # (C, Cr)
    w2t = w2.T                         # (Cr, C)

    img_bytes = C * HW * itemsize

    if img_bytes <= block_budget:
        # ---------------- Fused single pass ----------------
        bn = max(1, min(N, block_budget // img_bytes))
        if N >= 2:
            bn = min(bn, pl.cdiv(N, 2))   # >=2 grid steps -> both v7x cores work
        n_grid = pl.cdiv(N, bn)
        out = pl.pallas_call(
            functools.partial(_fused_kernel, inv_hw=1.0 / HW),
            out_shape=jax.ShapeDtypeStruct((N, C, HW), x.dtype),
            grid_spec=pltpu.PrefetchScalarGridSpec(
                num_scalar_prefetch=0,
                grid=(n_grid,),
                in_specs=[
                    pl.BlockSpec((bn, C, HW), lambda n: (n, 0, 0)),
                    pl.BlockSpec((C, Cr), lambda n: (0, 0)),
                    pl.BlockSpec((Cr, C), lambda n: (0, 0)),
                ],
                out_specs=pl.BlockSpec((bn, C, HW), lambda n: (n, 0, 0)),
            ),
            compiler_params=pltpu.CompilerParams(
                dimension_semantics=("parallel",),
                vmem_limit_bytes=vmem_limit),
        )(x_flat, w1t, w2t)
        return out.reshape(N, C, H, W)

    # ---------------- Tiled two-pass fallback (large images) ----------------
    row_bytes = C * itemsize
    lanes_budget = max(1, block_budget // (row_bytes * _LANE))
    n_lane_blocks = pl.cdiv(HW, _LANE)
    thw = min(lanes_budget, n_lane_blocks) * _LANE
    h_grid = pl.cdiv(HW, thw)
    need_mask = (HW % thw) != 0

    # Pass 1: streaming pool + fused SE-MLP -> (N, C, 1) f32 scales.
    scales = pl.pallas_call(
        functools.partial(_pool_mlp_kernel, inv_hw=1.0 / HW, hw=HW, thw=thw,
                          need_mask=need_mask),
        out_shape=jax.ShapeDtypeStruct((N, C, 1), jnp.float32),
        grid_spec=pltpu.PrefetchScalarGridSpec(
            num_scalar_prefetch=0,
            grid=(N, h_grid),
            in_specs=[
                pl.BlockSpec((1, C, thw), lambda n, h: (n, 0, h)),
                pl.BlockSpec((C, Cr), lambda n, h: (0, 0)),
                pl.BlockSpec((Cr, C), lambda n, h: (0, 0)),
            ],
            out_specs=pl.BlockSpec((1, C, 1), lambda n, h: (n, 0, 0)),
            scratch_shapes=[pltpu.VMEM((1, C), jnp.float32)],
        ),
        compiler_params=pltpu.CompilerParams(
            dimension_semantics=("parallel", "arbitrary"),
            vmem_limit_bytes=vmem_limit),
    )(x_flat, w1t, w2t)

    # Pass 2: pure streaming channel-wise rescale.
    out = pl.pallas_call(
        _scale_kernel,
        out_shape=jax.ShapeDtypeStruct((N, C, HW), x.dtype),
        grid_spec=pltpu.PrefetchScalarGridSpec(
            num_scalar_prefetch=0,
            grid=(N, h_grid),
            in_specs=[
                pl.BlockSpec((1, C, thw), lambda n, h: (n, 0, h)),
                pl.BlockSpec((1, C, 1), lambda n, h: (n, 0, 0)),
            ],
            out_specs=pl.BlockSpec((1, C, thw), lambda n, h: (n, 0, h)),
        ),
        compiler_params=pltpu.CompilerParams(
            dimension_semantics=("parallel", "parallel"),
            vmem_limit_bytes=vmem_limit),
    )(x_flat, scales)
    return out.reshape(N, C, H, W)


def ca_layer_ref(x, w1, w2):
    # Pure-JAX reference matching the PyTorch forward.
    y = jnp.mean(x, axis=(2, 3), keepdims=True)             # (N, C, 1, 1)
    y = jnp.einsum('oc,nchw->nohw', w1, y)                   # 1x1 conv, no bias
    y = jnp.maximum(y, 0.0)
    y = jnp.einsum('oc,nchw->nohw', w2, y)                   # 1x1 conv, no bias
    y = jax.nn.sigmoid(y)
    return x * y


if __name__ == "__main__":
    # Small shapes consistent with the module: channel=32, reduction=4.
    N, C, H, W = 2, 32, 16, 16
    reduction = 4
    Cr = C // reduction

    key = jax.random.PRNGKey(0)
    kx, k1, k2 = jax.random.split(key, 3)
    x = jax.random.normal(kx, (N, C, H, W), dtype=jnp.float32)
    # Deterministic synthetic weights for the two 1x1 convs (bias=False).
    w1 = 0.1 * jax.random.normal(k1, (Cr, C), dtype=jnp.float32)
    w2 = 0.1 * jax.random.normal(k2, (C, Cr), dtype=jnp.float32)

    # 1) Fused single-pass path (whole image fits one block).
    out = jax.block_until_ready(ca_layer(x, w1, w2))
    ref = ca_layer_ref(x, w1, w2)
    assert out.shape == (N, C, H, W)
    assert jnp.allclose(out, ref, atol=1e-4, rtol=1e-4)

    # 2) Fused path with a ragged spatial extent (H*W not a multiple of 128).
    x2 = jax.random.normal(kx, (N, C, 15, 15), dtype=jnp.float32)
    out2 = jax.block_until_ready(ca_layer(x2, w1, w2))
    ref2 = ca_layer_ref(x2, w1, w2)
    assert jnp.allclose(out2, ref2, atol=1e-4, rtol=1e-4)

    # 3) Force the tiled two-pass path (masked spatial tail) via a tiny budget.
    out3 = jax.block_until_ready(
        ca_layer(x2, w1, w2, block_budget_bytes=C * _LANE * 4))
    assert jnp.allclose(out3, ref2, atol=1e-4, rtol=1e-4)

    print("KERNEL_OK")
</pallas_src>

<mosaic_0001>
module attributes {stable_mosaic.version = 11 : i64} {
  func.func @_fused_kernel(%arg0: i32, %arg1: memref<1x32x256xf32, #tpu.memory_space<vmem>>, %arg2: memref<32x8xf32, #tpu.memory_space<vmem>>, %arg3: memref<8x32xf32, #tpu.memory_space<vmem>>, %arg4: memref<1x32x256xf32, #tpu.memory_space<vmem>>) attributes {dimension_semantics = [#tpu.dimension_semantics<parallel>], iteration_bounds = array<i64: 2>, scalar_prefetch = 0 : i64, scratch_operands = 0 : i64, tpu.core_type = #tpu.core_type<tc>, window_params = [{transform_indices = @transform_0, window_bounds = array<i64: 1, 32, 256>}, {pipeline_mode = #tpu.pipeline_mode<synchronous>, transform_indices = @transform_1, window_bounds = array<i64: 32, 8>}, {pipeline_mode = #tpu.pipeline_mode<synchronous>, transform_indices = @transform_2, window_bounds = array<i64: 8, 32>}, {transform_indices = @transform_3, window_bounds = array<i64: 1, 32, 256>}]} {
    %c0 = arith.constant 0 : index
    %c0_0 = arith.constant 0 : index
    %c0_1 = arith.constant 0 : index
    %0 = vector.load %arg1[%c0, %c0_0, %c0_1] : memref<1x32x256xf32, #tpu.memory_space<vmem>>, vector<1x32x256xf32>
    %cst = arith.constant dense<0.000000e+00> : vector<1x32xf32>
    %1 = vector.multi_reduction <add>, %0, %cst [2] : vector<1x32x256xf32> to vector<1x32xf32>
    %cst_2 = arith.constant 3.906250e-03 : f32
    %2 = vector.broadcast %cst_2 : f32 to vector<1x32xf32>
    %3 = arith.mulf %1, %2 : vector<1x32xf32>
    %c0_3 = arith.constant 0 : index
    %c0_4 = arith.constant 0 : index
    %4 = vector.load %arg2[%c0_3, %c0_4] : memref<32x8xf32, #tpu.memory_space<vmem>>, vector<32x8xf32>
    %cst_5 = arith.constant dense<0.000000e+00> : vector<1x8xf32>
    %5 = tpu.matmul %3, %4, %cst_5 {dimension_numbers = #tpu.dot_dimension_numbers<[1], [0], [0], [1], [0, 0, 1, 1], [], []>} : vector<1x32xf32>, vector<32x8xf32>, vector<1x8xf32> -> vector<1x8xf32>
    %cst_6 = arith.constant 0.000000e+00 : f32
    %6 = vector.broadcast %cst_6 : f32 to vector<1x8xf32>
    %7 = arith.maximumf %5, %6 : vector<1x8xf32>
    %c0_7 = arith.constant 0 : index
    %c0_8 = arith.constant 0 : index
    %8 = vector.load %arg3[%c0_7, %c0_8] : memref<8x32xf32, #tpu.memory_space<vmem>>, vector<8x32xf32>
    %cst_9 = arith.constant dense<0.000000e+00> : vector<1x32xf32>
    %9 = tpu.matmul %7, %8, %cst_9 {dimension_numbers = #tpu.dot_dimension_numbers<[1], [0], [0], [1], [0, 0, 1, 1], [], []>} : vector<1x8xf32>, vector<8x32xf32>, vector<1x32xf32> -> vector<1x32xf32>
    %10 = arith.negf %9 : vector<1x32xf32>
    %11 = math.exp %10 : vector<1x32xf32>
    %cst_10 = arith.constant 1.000000e+00 : f32
    %12 = vector.broadcast %cst_10 : f32 to vector<1x32xf32>
    %13 = arith.addf %12, %11 : vector<1x32xf32>
    %14 = arith.divf %12, %13 : vector<1x32xf32>
    %15 = vector.shape_cast %14 : vector<1x32xf32> to vector<1x32x1xf32>
    %16 = vector.broadcast %15 : vector<1x32x1xf32> to vector<1x32x256xf32>
    %17 = arith.mulf %0, %16 : vector<1x32x256xf32>
    %c0_11 = arith.constant 0 : index
    %c0_12 = arith.constant 0 : index
    %c0_13 = arith.constant 0 : index
    %18 = vector.load %arg4[%c0_11, %c0_12, %c0_13] : memref<1x32x256xf32, #tpu.memory_space<vmem>>, vector<1x32x256xf32>
    tpu.vector_store %arg4[%c0_11, %c0_12, %c0_13], %17 {strides = array<i32>} : memref<1x32x256xf32, #tpu.memory_space<vmem>>, vector<1x32x256xf32>,
    return
  }
  func.func @transform_0(%arg0: i32) -> (i32, i32, i32) {
    %c0_i32 = arith.constant 0 : i32
    %c0_i32_0 = arith.constant 0 : i32
    %c0_i32_1 = arith.constant 0 : i32
    return %arg0, %c0_i32, %c0_i32_0 : i32, i32, i32
  }
  func.func @transform_1(%arg0: i32) -> (i32, i32) {
    %c0_i32 = arith.constant 0 : i32
    %c0_i32_0 = arith.constant 0 : i32
    %c0_i32_1 = arith.constant 0 : i32
    return %c0_i32, %c0_i32_0 : i32, i32
  }
  func.func @transform_2(%arg0: i32) -> (i32, i32) {
    %c0_i32 = arith.constant 0 : i32
    %c0_i32_0 = arith.constant 0 : i32
    %c0_i32_1 = arith.constant 0 : i32
    return %c0_i32, %c0_i32_0 : i32, i32
  }
  func.func @transform_3(%arg0: i32) -> (i32, i32, i32) {
    %c0_i32 = arith.constant 0 : i32
    %c0_i32_0 = arith.constant 0 : i32
    %c0_i32_1 = arith.constant 0 : i32
    return %arg0, %c0_i32, %c0_i32_0 : i32, i32, i32
  }
}

</mosaic_0001>

<bundles_post_ra>
// kernel: tpu_custom_call.1
= control target key start
LH: loop header
LB: loop body
LE: loop exit
PB: predicated region body
PF: predicated region fallthrough
CT: control target
= control target key end

     0   :  { %8 = vsyncpa [#allocation3], 0  ;;  %s814_s0 = inlined_call_operand.hbm [shape: f32[2,32,256], index: 0, kind: input, shape index: {}]   ;;  %s815_s1 = inlined_call_operand.vmem [shape: f32[32,8], index: 1, kind: input, shape index: {}]   ;;  %s816_s2 = inlined_call_operand.vmem [shape: f32[8,32], index: 2, kind: input, shape index: {}]   ;;  %s817_s3 = inlined_call_operand.hbm [shape: f32[2,32,256], index: 3, kind: output, shape index: {}]  }
   0x1   :  { %10 = vsyncpa [#allocation3 + $0x1], 0 }
   0x2   :  { %11 = vsyncpa [#allocation4], 0 }
   0x3   :  { %13 = vsyncpa [#allocation4 + $0x1], 0  ;;  %s636_s12 = smov 0   ;;  %s638_s13 = smov 0  }
   0x4   :  { %s640_s14 = smov 0   ;;  %s642_s15 = smov 0  }
   0x5 LB: > { %s657_s16 = sadd.s32 4294967295, %s610_s15   ;;  %s436_s17 = sadd.s32 4294967294, %s610_s15   ;;  %s610_s15 = sphi %s642_s15, %s827_s15   ;;  %s606_s14 = sphi %s640_s14, %s826_s14   ;;  %s602_s13 = sphi %s638_s13, %s825_s13   ;;  %s598_s12 = sphi %s636_s12, %s824_s12  }
   0x6   : > { %s661_s18 = sadd.s32 1, %s610_s15   ;;  %s26_s19 = sadd.s32 1, %s606_s14 }
   0x7   : > { %s23_s20 = ssub.s32 %s610_s15, %s661_s18  ;;  %p33_p0 = scmp.ne.s32.totalorder %s606_s14, %s602_s13 }
   0x8   : > { %p24_p1 = scmp.eq.s32.totalorder %s23_s20, 0  ;;  %p34_p2 = scmp.eq.s32.totalorder %s610_s15, 0 }
   0x9   : > { %p39_p3 = scmp.ne.s32.totalorder %s602_s13, %s598_s12  ;;  %p40_p4 = scmp.eq.s32.totalorder %s657_s16, 0 }
   0xa   : > { %s673_s21 = scalar_select %p24_p1, %s606_s14, %s26_s19  }
   0xb   : > { %p675_p5 = por %p34_p2, %p33_p0  ;;  %p679_p6 = por %p40_p4, %p39_p3 }
   0xc   : > { %p105_p7 = scmp.eq.s32.totalorder %s657_s16, 1  ;;  %p111_p8 = scmp.eq.s32.totalorder %s436_s17, 1 }
   0xd   : > { %p467_p10 = scmp.lt.s32.totalorder %s610_s15, 2  ;;  %s137_s26 = sand.u32 1, %s606_s14  }
   0xe   : > { %p686_p11 = por %p105_p7, %p33_p0  ;;  %p690_p12 = por %p111_p8, %p39_p3 }
   0xf   : > { %s453_s27 = sshll.u32 %s610_s15, 6  ;;  %s439_s28 = sshll.u32 %s137_s26, 6 }
  0x10   : > { %s146_s4 = scalar_lea.hbm %s814_s0, %s453_s27  ;;  %s141_s6 = scalar_lea.vmem [#allocation2], %s439_s28 }
  0x11   : > { %s147_s5 = sshll.u32 %s146_s4, 4  ;;  %s149_s7 = sshll.u32 %s141_s6, 4  ;;  %s148_s5 = int_to_ptr.hbm [resolvable:$true] %s147_s5  ;;  %s150_s7 = int_to_ptr.vmem [resolvable:$true] %s149_s7 }
  0x12   : > { %p701_p13 = pnand %p467_p10, %p675_p5  ;;  %p442_p0 = scmp.ge.s32.totalorder %s610_s15, 1 }
  0x13   : > { %p157_p1 = scmp.lt.s32.totalorder %s610_s15, 3  ;;  %s138_s9 = scalar_lea.sflag [#allocation3], %s137_s26 }
  0x14   : > { %s514_s10 = sshra.s32 %s148_s5, 4  ;;  %p518_p3 = pneg %p701_p13  ;;  %s515_s10 = int_to_ptr.hbm [resolvable:$true] %s514_s10 }
  0x15   : > { %s516_s11 = scalar_lea.hbm %s515_s10, 64  ;;  %s521_s20 = scalar_lea.hbm %s814_s0, 128 }
  0x16   : > { %p517_p2 = scmp.ne.s32.totalorder %s515_s10, %s516_s11  ;;  %p522_p5 = scmp.lt.s32.totalorder %s515_s10, %s814_s0 }
  0x17   : > { %p523_p8 = scmp.lt.s32.totalorder %s521_s20, %s516_s11 }
  0x18   : > { %p519_p4 = pnand %p518_p3, %p517_p2 }
  0x19   : > { %p524_p10 = por %p523_p8, %p522_p5 }
  0x1a   : > { %p520_p7 = pneg %p519_p4 }
  0x1c   : > { %p525_p9 = pnand %p524_p10, %p520_p7 }
  0x1e   : > { %528 = shalt.err (!%p525_p9)
}
  0x1f   : > { %s612_s26 = smov 256   ;;  %s613_s28 = smov 16  }
  0x20   : > { %462 = dma.hbm_to_vmem [thread:$0]  (!%p701_p13), %s148_s5, 1024, %s150_s7, %s138_s9, %s612_s26, %s612_s26, %s613_s28  }
  0x21   : > { %p158_p2 = pnand %p442_p0, %p157_p1 }
  0x22   : > { %s722_s29 = sand.u32 (!%p158_p2), 1, %s602_s13  }
  0x23   : > { %161 = sbr.rel (%p158_p2) target bundleno = 583 (0x247), region = 32  ;;  %s443_s30 = sshll.u32 (!%p158_p2), %s722_s29, 6 }
  0x24   : > { %s164_s4 = scalar_lea.sflag (!%p158_p2), [#allocation3], %s722_s29  ;;  %s167_s6 = scalar_lea.vmem (!%p158_p2), [#allocation2], %s443_s30 }
  0x28   : > { %589 = dma.done.wait (%p679_p6), %s164_s4, 1024  }
  0x29   : > { %591 = vsyncadd (%p679_p6), %s164_s4, 4294966272  ;;  %v732_v0 = vld [vmem:[%s167_s6] sm:$0xff]  ;;  %v734_v1 = vld [vmem:[%s167_s6 + $0x8] sm:$0xff]  ;;  %v223_v16 = vlaneseq  ;;  %vm228_vm0 = vcmask 130112   ;;  %vm232_vm1 = vcmask 195712   ;;  %vm236_vm2 = vcmask 261312  }
  0x2a   : > { %v736_v2 = vld [vmem:[%s167_s6 + $0x20] sm:$0xff]  ;;  %v199_v3 = vadd.f32 %v734_v1, %v732_v0  ;;  %v740_v4 = vld [vmem:[%s167_s6 + $0x28] sm:$0xff]  ;;  %v744_v6 = vld [vmem:[%s167_s6 + $0x10] sm:$0xff]  ;;  %vm238_vm3 = vcmask 261120   ;;  %vm263_vm4 = vcmask 64512   ;;  %s190_s22 = scalar_lea.vmem [#allocation5], %s443_s30 }
  0x2b   : > { %v205_v5 = vadd.f32 %v740_v4, %v736_v2  ;;  %v746_v7 = vld [vmem:[%s167_s6 + $0x18] sm:$0xff]  ;;  %v748_v8 = vld [vmem:[%s167_s6 + $0x30] sm:$0xff]  ;;  %v216_v14 = vld [vmem:[%s815_s1 + $0x8] sm:$0xff]  ;;  %v224_v19 = vand.u32 127, %v223_v16  ;;  %v308_v39 = vshrl.u32 %v223_v16, 7  ;;  %s454_s27 = sshll.u32 %s657_s16, 6 }
  0x2c   : > { %200 = vadd.xlane.f32.xlu0 %v199_v3  ;;  %v750_v9 = vld [vmem:[%s167_s6 + $0x38] sm:$0xff]  ;;  %v202_v10 = vadd.f32 %v746_v7, %v744_v6  ;;  %v217_v13 = vld [vmem:[%s815_s1 + $0x10] sm:$0xff]  ;;  %v215_v15 = vld [vmem:[%s815_s1] sm:$0xff]  ;;  %s359_s4 = scalar_lea.hbm %s817_s3, %s454_s27  ;;  %s360_s6 = sshll.u32 %s190_s22, 4  ;;  %s361_s6 = int_to_ptr.vmem [resolvable:$true] %s360_s6 }
  0x2d   : > { %206 = vadd.xlane.f32.xlu1 %v205_v5  ;;  %v208_v11 = vadd.f32 %v750_v9, %v748_v8  ;;  %v218_v12 = vld [vmem:[%s815_s1 + $0x18] sm:$0xff]  ;;  %v226_v21 = vadd.s32 4294967288, %v224_v19  ;;  %v230_v22 = vadd.s32 4294967280, %v224_v19  ;;  %v234_v25 = vadd.s32 4294967272, %v224_v19  ;;  %v262_v36 = vld [vmem:[%s816_s2] sm:$0xff]  ;;  %505 = vset.pattern.permute.xlu2 %v308_v39  ;;  %s362_s23 = sshll.u32 %s359_s4, 4  ;;  %s363_s23 = int_to_ptr.hbm [resolvable:$true] %s362_s23 }
  0x2e   : > { %253 = vmatpush.msra.mxu0 %v218_v12  ;;  %282 = vmatpush.msra.mxu1 %v262_v36  ;;  %v327_v40 = vadd.s32 24, %v308_v39  ;;  %v321_v41 = vadd.s32 16, %v308_v39  ;;  %v315_v57 = vadd.s32 8, %v308_v39  ;;  %s348_s16 = scalar_lea.sflag [#allocation4], %s722_s29  ;;  %s558_s30 = sshra.s32 %s363_s23, 4  ;;  %s559_s30 = int_to_ptr.hbm [resolvable:$true] %s558_s30 }
  0x2f   : > { %s560_s5 = scalar_lea.hbm %s559_s30, 64  ;;  %s564_s9 = scalar_lea.hbm %s817_s3, 128 }
  0x30   : > { %254 = vmatpush.msra.mxu0 %v217_v13  ;;  %508 = vset.pattern.permute.xlu1 %v327_v40  ;;  %p561_p6 = scmp.ne.s32.totalorder %s559_s30, %s560_s5  ;;  %p565_p0 = scmp.lt.s32.totalorder %s559_s30, %s817_s3 }
  0x31   : > { %507 = vset.pattern.permute.xlu0 %v321_v41  ;;  %p566_p1 = scmp.lt.s32.totalorder %s564_s9, %s560_s5 }
  0x32   : > { %255 = vmatpush.msra.mxu0 %v216_v14  ;;  %p562_p9 = pnand %p561_p6, %p686_p11 }
  0x33   : > { %p567_p3 = por %p566_p1, %p565_p0 }
  0x34   : > { %203 = vadd.xlane.f32.xlu0 %v202_v10  ;;  %256 = vmatpush.msra.mxu0 %v215_v15  ;;  %p563_p13 = pneg %p562_p9 }
  0x35   : > { %209 = vadd.xlane.f32.xlu1 %v208_v11 }
  0x36   : > { %p568_p4 = pnand %p567_p3, %p563_p13 }
  0x9f   : > { %v201_v17 = vpop.xlane.xlu0 %200 }
  0xa0   : > { %v207_v18 = vpop.xlane.xlu1 %206  ;;  %v211_v20 = vmul.f32 0.00390625, %v201_v17 }
  0xa1   : > { %v213_v23 = vmul.f32 0.00390625, %v207_v18 }
  0xa2   : > { %v225_v29 = vperm.slane %v211_v20, %v224_v19 }
  0xa3   : > { %v231_v31 = vperm.slane %v213_v23, %v230_v22 }
  0xa7   : > { %v204_v24 = vpop.xlane.xlu0 %203 }
  0xa8   : > { %v212_v26 = vmul.f32 0.00390625, %v204_v24  ;;  %v210_v27 = vpop.xlane.xlu1 %209 }
  0xa9   : > { %v214_v28 = vmul.f32 0.00390625, %v210_v27 }
  0xaa   : > { %v227_v30 = vperm.slane %v212_v26, %v226_v21 }
  0xab   : > { %v235_v32 = vperm.slane %v214_v28, %v234_v25 }
  0xac   : > { %v229_v33 = vsel %vm228_vm0, %v227_v30, %v225_v29 }
  0xad   : > { %v233_v34 = vsel %vm232_vm1, %v231_v31, %v229_v33 }
  0xae   : > { %v237_v35 = vsel %vm236_vm2, %v235_v32, %v233_v34 }
  0xaf   : > { %445 = vmatmul.msk.f32.vlgmr.msra.gmra.mxu0 %vm238_vm3, %v237_v35 }
 0x12c   : > { %v258_v37 = vpop.f32.mrf.mxu0 }
 0x12d   : > { %v261_v38 = vmax.f32 %v258_v37, 0.0 }
 0x12f   : > { %446 = vmatmul.msk.f32.vlgmr.msra.gmra.mxu1 %vm263_vm4, %v261_v38 }
 0x1ac   : > { %v284_v42 = vpop.f32.mrf.mxu1 }
 0x1ad   : > { %v447_v43 = vmul.f32 -1.442695, %v284_v42 }
 0x1af   : > { %510 = vpow2.f32 %v447_v43 }
 0x1b5   : > { %v511_v44 = vpop.eup %510 }
 0x1b6   : > { %v290_v45 = vadd.f32 1.0, %v511_v44 }
 0x1b8   : > { %512 = vrcp.f32 %v290_v45  ;;  %v302_v49 = vand.u32 2147483648, %v290_v45  ;;  %v300_v51 = vand.u32 2147483647, %v290_v45  ;;  %vm296_vm6 = vweird.f32 %v290_v45 }
 0x1ba   : > { %v303_v53 = vor.u32 1.1754944e-38, %v302_v49  ;;  %vm301_vm8 = vcmp.eq.f32.partialorder %v300_v51, 8.507059e+37 }
 0x1be   : > { %v513_v46 = vpop.eup %512 }
 0x1bf   : > { %v292_v47 = vmul.f32 %v513_v46, %v290_v45  ;;  %vm297_vm5 = vweird.f32 %v513_v46 }
 0x1c0   : > { %vm298_vm7 = vmor %vm296_vm6, %vm297_vm5 }
 0x1c1   : > { %v293_v48 = vsub.f32 1.0, %v292_v47 }
 0x1c3   : > { %v294_v50 = vmul.f32 %v513_v46, %v293_v48 }
 0x1c5   : > { %v295_v52 = vadd.f32 %v513_v46, %v294_v50 }
 0x1c7   : > { %v299_v54 = vsel %vm298_vm7, %v513_v46, %v295_v52 }
 0x1c8   : > { %v304_v55 = vsel %vm301_vm8, %v303_v53, %v299_v54 }
 0x1c9   : > { %v306_v56 = vperm.slane %v304_v55, 0 }
 0x1cb   : > { %329 = vperm.xlu1 %508, %v306_v56   ;;  %323 = vperm.xlu0 %507, %v306_v56  }
 0x1cc   : > { %311 = vperm.xlu2 %505, %v306_v56  }
 0x1d3   : > { %509 = vset.pattern.permute.xlu0 %v327_v40 }
 0x1d4   : > { %506 = vset.pattern.permute.xlu2 %v315_v57 }
 0x1dc   : > { %317 = vperm.xlu2 %506, %v306_v56  }
 0x226   : > { %v312_v58 = vpop.permute.xlu2 %311 }
 0x227   : > { %v331_v59 = vmul.f32 %v312_v58, %v732_v0  ;;  %v332_v60 = vmul.f32 %v312_v58, %v734_v1 }
 0x229   : > { %339 = vst [vmem:[%s190_s22] sm:$0xff] %v331_v59 }
 0x22a   : > { %340 = vst [vmem:[%s190_s22 + $0x8] sm:$0xff] %v332_v60 }
 0x236   : > { %v318_v61 = vpop.permute.xlu2 %317 }
 0x237   : > { %v333_v62 = vmul.f32 %v318_v61, %v744_v6  ;;  %v334_v63 = vmul.f32 %v318_v61, %v746_v7 }
 0x239   : > { %341 = vst [vmem:[%s190_s22 + $0x10] sm:$0xff] %v333_v62 }
 0x23a   : > { %342 = vst [vmem:[%s190_s22 + $0x18] sm:$0xff] %v334_v63 }
 0x23d   : > { %v330_v0 = vpop.permute.xlu1 %329  ;;  %v324_v1 = vpop.permute.xlu0 %323 }
 0x23e   : > { %v337_v3 = vmul.f32 %v330_v0, %v748_v8  ;;  %v338_v5 = vmul.f32 %v330_v0, %v750_v9  ;;  %v335_v6 = vmul.f32 %v324_v1, %v736_v2  ;;  %v336_v7 = vmul.f32 %v324_v1, %v740_v4 }
 0x240   : > { %345 = vst [vmem:[%s190_s22 + $0x30] sm:$0xff] %v337_v3 }
 0x241   : > { %346 = vst [vmem:[%s190_s22 + $0x38] sm:$0xff] %v338_v5 }
 0x242   : > { %343 = vst [vmem:[%s190_s22 + $0x20] sm:$0xff] %v335_v6 }
 0x243   : > { %344 = vst [vmem:[%s190_s22 + $0x28] sm:$0xff] %v336_v7 }
 0x244   : > { %571 = shalt.err (!%p568_p4)
}
 0x245   : > { %s614_s29 = smov 256   ;;  %s615_s17 = smov 16  }
 0x246   : > { %457 = dma.vmem_to_hbm [thread:$0]  (%p686_p11), %s361_s6, 1024, %s363_s23, %s348_s16, %s614_s29, %s614_s29, %s615_s17  }
 0x247 PF: > { %s377_s19 = sand.u32 1, %s598_s12   ;;  %p823_p7 = scmp.ge.s32.totalorder %s610_s15, 2 }
 0x248   : > { %s378_s20 = scalar_lea.sflag [#allocation4], %s377_s19 }
 0x249   : > { %p464_p5 = pnand %p823_p7, %p690_p12 }
 0x24b   : > { %p465_p8 = pneg %p464_p5 }
 0x24d   : > { %593 = dma.done.wait (%p465_p8), %s378_s20, 1024  }
 0x24e   : > { %595 = vsyncadd (%p465_p8), %s378_s20, 4294966272  ;;  %p16_p10 = scmp.ge.s32.totalorder %s661_s18, 4   ;;  %s824_s12 = smov %s602_s13 }
 0x24f   : > { %s825_s13 = smov %s606_s14  ;;  %s826_s14 = smov %s673_s21 }
 0x250   : > { %s827_s15 = smov %s661_s18  ;;  %18 = sbr.rel (!%p16_p10) target bundleno = 5 (0x5), region = 77 }
 0x255   :  { %384 = vsyncpa [#allocation3], 1 }
 0x256   :  { %386 = vsyncpa [#allocation3 + $0x1], 1 }
 0x257   :  { %387 = vsyncpa [#allocation4], 1 }
 0x258   :  { %389 = vsyncpa [#allocation4 + $0x1], 1 }

</bundles_post_ra>
